<compile_context>
chip_gen: v5e
topology: v5e:2x2
jax: 0.10.0
libtpu: 0.0.40
codegen_flags: <defaults>
</compile_context>

<pallas_src>
import jax
import jax.numpy as jnp
from jax.experimental import pallas as pl
from jax.experimental.pallas import tpu as pltpu


def _round_up(x, m):
    return ((x + m - 1) // m) * m


def _pick_row_tile(rows, row_tile, min_steps=4):
    """Largest tile that divides `rows`, is a multiple of 8, <= row_tile,
    preferring a tile that yields at least `min_steps` grid steps (so v7x's
    two TensorCores each see >= 2 pipelined steps).  Returns None if no
    multiple-of-8 divisor exists (caller falls back to padding)."""
    best = None
    tm = min(row_tile, rows)
    tm -= tm % 8
    while tm >= 8:
        if rows % tm == 0:
            if best is None:
                best = tm
            if rows // tm >= min_steps:
                return tm
        tm -= 8
    return best


def _wrap_vision_kernel(m_ref, x_ref, w1_ref, b1_ref, w2_ref, b2_ref, o_ref):
    # x_ref: (TM, H) f32, m_ref: (TM, 1) f32 (lane-broadcast over H),
    # W1/W2: bf16, biases: f32.
    # Mask multiply in f32 (v5e has no bf16 VALU), single cast to bf16 for MXU.
    xm = (x_ref[...] * m_ref[...]).astype(jnp.bfloat16)            # (TM, H)

    # ---- process: masked linear + ReLU (f32 accumulation on the MXU) ----
    h = jnp.dot(xm, w1_ref[...], preferred_element_type=jnp.float32)   # (TM, H)
    h = jnp.maximum(h + b1_ref[...], 0.0).astype(jnp.bfloat16)

    # ---- encoder: linear + GELU (tanh approximation -> EUP) ----
    y = jnp.dot(h, w2_ref[...], preferred_element_type=jnp.float32)    # (TM, O)
    y = jax.nn.gelu(y + b2_ref[...], approximate=True)

    o_ref[...] = y.astype(o_ref.dtype)


def prepare_vision_params(w1, b1, w2, b2):
    """One-time parameter preparation (outside the per-call path):
    bf16 matmul weights, f32 row-vector biases."""
    H = w1.shape[0]
    O = w2.shape[1]
    return (w1.astype(jnp.bfloat16),
            b1.reshape(1, H).astype(jnp.float32),
            w2.astype(jnp.bfloat16),
            b2.reshape(1, O).astype(jnp.float32))


def _vmem_limit_bytes(tm, H, O):
    x_bufs = 2 * tm * H * 4                 # double-buffered f32 x tiles
    m_bufs = 2 * tm * 128 * 4               # mask tile, lane-padded to 128
    w_res = H * H * 2 + H * O * 2           # single-buffered bf16 weights
    b_res = 8 * H * 4 + 8 * O * 4           # biases, sublane-padded to 8
    o_bufs = 2 * tm * O * 4                 # double-buffered f32 output tiles
    interm = 2 * tm * (H + O) * 4           # f32 intermediates headroom
    total = x_bufs + m_bufs + w_res + b_res + o_bufs + interm
    return min(64 << 20, max(int(total * 1.5), 16 << 20))


def wrap_vision_model(x, attention_mask, w1b, b1f, w2b, b2f, *,
                      row_tile=512, out_dtype=jnp.float32):
    """x: (B, S, H) f32, attention_mask: (B, S); weights already prepared via
    prepare_vision_params.  Returns (B, S, O) out_dtype."""
    B, S, H = x.shape
    O = w2b.shape[1]
    R = B * S

    xf = x.reshape(R, H).astype(jnp.float32)
    mf = attention_mask.reshape(R, 1).astype(jnp.float32)

    tm = _pick_row_tile(R, row_tile)
    if tm is None:
        # Rare fallback: rows not a multiple of 8 — pad (masked rows discarded).
        tm = min(row_tile, _round_up(R, 8))
        Rp = _round_up(R, tm)
        pad = Rp - R
        xf = jnp.pad(xf, ((0, pad), (0, 0)))
        mf = jnp.pad(mf, ((0, pad), (0, 0)))
    else:
        Rp = R

    grid = (Rp // tm,)

    cost = pl.CostEstimate(
        flops=2 * Rp * H * (H + O),
        transcendentals=Rp * O,                          # GELU tanh/exp path
        bytes_accessed=(Rp * H * 4 + Rp * 4              # x, mask (f32)
                        + H * H * 2 + H * O * 2          # W1, W2 (bf16)
                        + (H + O) * 4                    # biases (f32)
                        + Rp * O * jnp.dtype(out_dtype).itemsize),
    )

    out = pl.pallas_call(
        _wrap_vision_kernel,
        out_shape=jax.ShapeDtypeStruct((Rp, O), out_dtype),
        grid_spec=pltpu.PrefetchScalarGridSpec(
            num_scalar_prefetch=0,
            grid=grid,
            in_specs=[
                pl.BlockSpec((tm, 1), lambda i: (i, 0)),    # mask (rows, 1)
                pl.BlockSpec((tm, H), lambda i: (i, 0)),    # x    (rows, H)
                pl.BlockSpec((H, H), lambda i: (0, 0),      # W1 (resident)
                             pipeline_mode=pl.Buffered(1)),
                pl.BlockSpec((1, H), lambda i: (0, 0),      # b1
                             pipeline_mode=pl.Buffered(1)),
                pl.BlockSpec((H, O), lambda i: (0, 0),      # W2 (resident)
                             pipeline_mode=pl.Buffered(1)),
                pl.BlockSpec((1, O), lambda i: (0, 0),      # b2
                             pipeline_mode=pl.Buffered(1)),
            ],
            out_specs=pl.BlockSpec((tm, O), lambda i: (i, 0)),
        ),
        compiler_params=pltpu.CompilerParams(
            dimension_semantics=("parallel",),
            vmem_limit_bytes=_vmem_limit_bytes(tm, H, O),
        ),
        cost_estimate=cost,
    )(mf, xf, w1b, b1f, w2b, b2f)

    if Rp != R:
        out = out[:R]
    return out.reshape(B, S, O)


def wrap_vision_model_ref(x, attention_mask, w1b, b1f, w2b, b2f):
    """Pure-JAX reference mirroring the kernel numerics
    (f32 masking, bf16 matmul operands, f32 accumulation, tanh-GELU)."""
    xm = (x * attention_mask[..., None]).astype(jnp.bfloat16)
    h = jnp.einsum("bsh,hk->bsk", xm, w1b,
                   preferred_element_type=jnp.float32)
    h = jnp.maximum(h + b1f.reshape(1, 1, -1), 0.0).astype(jnp.bfloat16)
    y = jnp.einsum("bsk,ko->bso", h, w2b,
                   preferred_element_type=jnp.float32) + b2f.reshape(1, 1, -1)
    return jax.nn.gelu(y, approximate=True)


if __name__ == "__main__":
    # Lane-dense shapes: hidden / output are multiples of 128; B*S = 512 rows
    # -> row tile 128 -> 4 parallel grid steps (>= 2 per TensorCore on v7x).
    B, S, H, O = 4, 128, 128, 128

    key = jax.random.PRNGKey(0)
    k_x, k_m, k_w1, k_b1, k_w2, k_b2 = jax.random.split(key, 6)

    x = jax.random.normal(k_x, (B, S, H), dtype=jnp.float32)
    attention_mask = (jax.random.uniform(k_m, (B, S)) > 0.25).astype(jnp.float32)

    w1 = jax.random.normal(k_w1, (H, H), dtype=jnp.float32) * (1.0 / jnp.sqrt(H))
    b1 = jax.random.normal(k_b1, (1, H), dtype=jnp.float32) * 0.01
    w2 = jax.random.normal(k_w2, (H, O), dtype=jnp.float32) * (1.0 / jnp.sqrt(H))
    b2 = jax.random.normal(k_b2, (1, O), dtype=jnp.float32) * 0.01

    # One-time parameter prep (bf16 weights) — outside the per-call path.
    w1b, b1f, w2b, b2f = prepare_vision_params(w1, b1, w2, b2)

    out = wrap_vision_model(x, attention_mask, w1b, b1f, w2b, b2f)
    out = jax.block_until_ready(out)

    ref = wrap_vision_model_ref(x, attention_mask, w1b, b1f, w2b, b2f)
    assert out.shape == (B, S, O)
    assert jnp.allclose(out, ref, atol=2e-2, rtol=2e-2), "mismatch vs reference"

    print("KERNEL_OK")
</pallas_src>

<mosaic_0001>
module attributes {stable_mosaic.version = 11 : i64} {
  func.func @_wrap_vision_kernel(%arg0: i32, %arg1: memref<128x1xf32, #tpu.memory_space<vmem>>, %arg2: memref<128x128xf32, #tpu.memory_space<vmem>>, %arg3: memref<128x128xbf16, #tpu.memory_space<vmem>>, %arg4: memref<1x128xf32, #tpu.memory_space<vmem>>, %arg5: memref<128x128xbf16, #tpu.memory_space<vmem>>, %arg6: memref<1x128xf32, #tpu.memory_space<vmem>>, %arg7: memref<128x128xf32, #tpu.memory_space<vmem>>) attributes {dimension_semantics = [#tpu.dimension_semantics<parallel>], iteration_bounds = array<i64: 4>, scalar_prefetch = 0 : i64, scratch_operands = 0 : i64, tpu.core_type = #tpu.core_type<tc>, window_params = [{transform_indices = @transform_0, window_bounds = array<i64: 128, 1>}, {transform_indices = @transform_1, window_bounds = array<i64: 128, 128>}, {pipeline_mode = #tpu.pipeline_mode<synchronous>, transform_indices = @transform_2, window_bounds = array<i64: 128, 128>}, {pipeline_mode = #tpu.pipeline_mode<synchronous>, transform_indices = @transform_3, window_bounds = array<i64: 1, 128>}, {pipeline_mode = #tpu.pipeline_mode<synchronous>, transform_indices = @transform_4, window_bounds = array<i64: 128, 128>}, {pipeline_mode = #tpu.pipeline_mode<synchronous>, transform_indices = @transform_5, window_bounds = array<i64: 1, 128>}, {transform_indices = @transform_6, window_bounds = array<i64: 128, 128>}]} {
    %c0 = arith.constant 0 : index
    %c0_0 = arith.constant 0 : index
    %0 = vector.load %arg2[%c0, %c0_0] : memref<128x128xf32, #tpu.memory_space<vmem>>, vector<128x128xf32>
    %c0_1 = arith.constant 0 : index
    %c0_2 = arith.constant 0 : index
    %1 = vector.load %arg1[%c0_1, %c0_2] : memref<128x1xf32, #tpu.memory_space<vmem>>, vector<128x1xf32>
    %2 = vector.broadcast %1 : vector<128x1xf32> to vector<128x128xf32>
    %3 = arith.mulf %0, %2 : vector<128x128xf32>
    %4 = arith.truncf %3 : vector<128x128xf32> to vector<128x128xbf16>
    %c0_3 = arith.constant 0 : index
    %c0_4 = arith.constant 0 : index
    %5 = vector.load %arg3[%c0_3, %c0_4] : memref<128x128xbf16, #tpu.memory_space<vmem>>, vector<128x128xbf16>
    %cst = arith.constant dense<0.000000e+00> : vector<128x128xf32>
    %6 = tpu.matmul %4, %5, %cst {dimension_numbers = #tpu.dot_dimension_numbers<[1], [0], [0], [1], [0, 0, 1, 1], [], []>} : vector<128x128xbf16>, vector<128x128xbf16>, vector<128x128xf32> -> vector<128x128xf32>
    %c0_5 = arith.constant 0 : index
    %c0_6 = arith.constant 0 : index
    %7 = vector.load %arg4[%c0_5, %c0_6] : memref<1x128xf32, #tpu.memory_space<vmem>>, vector<1x128xf32>
    %8 = vector.broadcast %7 : vector<1x128xf32> to vector<128x128xf32>
    %9 = arith.addf %6, %8 : vector<128x128xf32>
    %cst_7 = arith.constant 0.000000e+00 : f32
    %10 = vector.broadcast %cst_7 : f32 to vector<128x128xf32>
    %11 = arith.maximumf %9, %10 : vector<128x128xf32>
    %12 = arith.truncf %11 : vector<128x128xf32> to vector<128x128xbf16>
    %c0_8 = arith.constant 0 : index
    %c0_9 = arith.constant 0 : index
    %13 = vector.load %arg5[%c0_8, %c0_9] : memref<128x128xbf16, #tpu.memory_space<vmem>>, vector<128x128xbf16>
    %cst_10 = arith.constant dense<0.000000e+00> : vector<128x128xf32>
    %14 = tpu.matmul %12, %13, %cst_10 {dimension_numbers = #tpu.dot_dimension_numbers<[1], [0], [0], [1], [0, 0, 1, 1], [], []>} : vector<128x128xbf16>, vector<128x128xbf16>, vector<128x128xf32> -> vector<128x128xf32>
    %c0_11 = arith.constant 0 : index
    %c0_12 = arith.constant 0 : index
    %15 = vector.load %arg6[%c0_11, %c0_12] : memref<1x128xf32, #tpu.memory_space<vmem>>, vector<1x128xf32>
    %16 = vector.broadcast %15 : vector<1x128xf32> to vector<128x128xf32>
    %17 = arith.addf %14, %16 : vector<128x128xf32>
    %18 = arith.mulf %17, %17 : vector<128x128xf32>
    %19 = arith.mulf %17, %18 : vector<128x128xf32>
    %cst_13 = arith.constant 4.471500e-02 : f32
    %20 = vector.broadcast %cst_13 : f32 to vector<128x128xf32>
    %21 = arith.mulf %20, %19 : vector<128x128xf32>
    %22 = arith.addf %17, %21 : vector<128x128xf32>
    %cst_14 = arith.constant 0.797884583 : f32
    %23 = vector.broadcast %cst_14 : f32 to vector<128x128xf32>
    %24 = arith.mulf %23, %22 : vector<128x128xf32>
    %25 = math.tanh %24 : vector<128x128xf32>
    %cst_15 = arith.constant 1.000000e+00 : f32
    %26 = vector.broadcast %cst_15 : f32 to vector<128x128xf32>
    %27 = arith.addf %26, %25 : vector<128x128xf32>
    %cst_16 = arith.constant 5.000000e-01 : f32
    %28 = vector.broadcast %cst_16 : f32 to vector<128x128xf32>
    %29 = arith.mulf %28, %27 : vector<128x128xf32>
    %30 = arith.mulf %17, %29 : vector<128x128xf32>
    %c0_17 = arith.constant 0 : index
    %c0_18 = arith.constant 0 : index
    %31 = vector.load %arg7[%c0_17, %c0_18] : memref<128x128xf32, #tpu.memory_space<vmem>>, vector<128x128xf32>
    tpu.vector_store %arg7[%c0_17, %c0_18], %30 {strides = array<i32>} : memref<128x128xf32, #tpu.memory_space<vmem>>, vector<128x128xf32>,
    return
  }
  func.func @transform_0(%arg0: i32) -> (i32, i32) {
    %c0_i32 = arith.constant 0 : i32
    %c0_i32_0 = arith.constant 0 : i32
    return %arg0, %c0_i32 : i32, i32
  }
  func.func @transform_1(%arg0: i32) -> (i32, i32) {
    %c0_i32 = arith.constant 0 : i32
    %c0_i32_0 = arith.constant 0 : i32
    return %arg0, %c0_i32 : i32, i32
  }
  func.func @transform_2(%arg0: i32) -> (i32, i32) {
    %c0_i32 = arith.constant 0 : i32
    %c0_i32_0 = arith.constant 0 : i32
    %c0_i32_1 = arith.constant 0 : i32
    return %c0_i32, %c0_i32_0 : i32, i32
  }
  func.func @transform_3(%arg0: i32) -> (i32, i32) {
    %c0_i32 = arith.constant 0 : i32
    %c0_i32_0 = arith.constant 0 : i32
    %c0_i32_1 = arith.constant 0 : i32
    return %c0_i32, %c0_i32_0 : i32, i32
  }
  func.func @transform_4(%arg0: i32) -> (i32, i32) {
    %c0_i32 = arith.constant 0 : i32
    %c0_i32_0 = arith.constant 0 : i32
    %c0_i32_1 = arith.constant 0 : i32
    return %c0_i32, %c0_i32_0 : i32, i32
  }
  func.func @transform_5(%arg0: i32) -> (i32, i32) {
    %c0_i32 = arith.constant 0 : i32
    %c0_i32_0 = arith.constant 0 : i32
    %c0_i32_1 = arith.constant 0 : i32
    return %c0_i32, %c0_i32_0 : i32, i32
  }
  func.func @transform_6(%arg0: i32) -> (i32, i32) {
    %c0_i32 = arith.constant 0 : i32
    %c0_i32_0 = arith.constant 0 : i32
    return %arg0, %c0_i32 : i32, i32
  }
}

</mosaic_0001>

<bundles_post_ra>
// kernel: tpu_custom_call.1
= control target key start
LH: loop header
LB: loop body
LE: loop exit
PB: predicated region body
PF: predicated region fallthrough
CT: control target
= control target key end

     0   :  { %11 = vsyncpa [#allocation3], 0  ;;  %s1631_s0 = inlined_call_operand.vmem [shape: f32[512,1], index: 0, kind: input, shape index: {}]   ;;  %s1632_s1 = inlined_call_operand.vmem [shape: f32[512,128], index: 1, kind: input, shape index: {}]   ;;  %s1633_s2 = inlined_call_operand.hbm [shape: bf16[128,128], index: 2, kind: input, shape index: {}]   ;;  %s1634_s3 = inlined_call_operand.vmem [shape: f32[1,128], index: 3, kind: input, shape index: {}]   ;;  %s1635_s4 = inlined_call_operand.hbm [shape: bf16[128,128], index: 4, kind: input, shape index: {}]   ;;  %s1636_s5 = inlined_call_operand.vmem [shape: f32[1,128], index: 5, kind: input, shape index: {}]   ;;  %s1637_s6 = inlined_call_operand.hbm [shape: f32[512,128], index: 6, kind: output, shape index: {}]  }
   0x1   :  { %12 = vsyncpa [#allocation6], 0 }
   0x2   :  { %13 = vsyncpa [#allocation4], 0 }
   0x3   :  { %15 = vsyncpa [#allocation4 + $0x1], 0  ;;  %s1366_s21 = smov 0   ;;  %s1368_s22 = smov 0  }
   0x4   :  { %s1370_s23 = smov 0   ;;  %s1372_s24 = smov 0  }
   0x5 LB: > { %s1387_s25 = sadd.s32 4294967295, %s1322_s24   ;;  %s975_s26 = sadd.s32 4294967294, %s1322_s24   ;;  %s1322_s24 = sphi %s1372_s24, %s1644_s24   ;;  %s1318_s23 = sphi %s1370_s23, %s1643_s23   ;;  %s1314_s22 = sphi %s1368_s22, %s1642_s22   ;;  %s1310_s21 = sphi %s1366_s21, %s1641_s21  }
   0x6   : > { %s1391_s27 = sadd.s32 1, %s1322_s24   ;;  %s164_s28 = sadd.s32 1, %s1318_s23 }
   0x7   : > { %s161_s29 = ssub.s32 %s1322_s24, %s1391_s27  ;;  %p174_p0 = scmp.ne.s32.totalorder %s1318_s23, %s1314_s22 }
   0x8   : > { %p162_p1 = scmp.eq.s32.totalorder %s161_s29, 0  ;;  %p175_p2 = scmp.eq.s32.totalorder %s1387_s25, 3 }
   0x9   : > { %p180_p3 = scmp.ne.s32.totalorder %s1314_s22, %s1310_s21  ;;  %p181_p4 = scmp.eq.s32.totalorder %s975_s26, 3 }
   0xa   : > { %s1402_s30 = scalar_select %p162_p1, %s1318_s23, %s164_s28  }
   0xb   : > { %p1404_p5 = por %p175_p2, %p174_p0  ;;  %p1408_p6 = por %p181_p4, %p180_p3 }
   0xc   : > { %p976_p7 = scmp.ge.s32.totalorder %s1322_s24, 1  ;;  %p188_p8 = scmp.lt.s32.totalorder %s1322_s24, 5 }
   0xd   : > { %p1111_p9 = scmp.eq.s32.totalorder %s1387_s25, 0  ;;  %s199_s12 = sshll.u32 %s1633_s2, 4  ;;  %s200_s12 = int_to_ptr.hbm [resolvable:$true] %s199_s12 }
   0xe   : > { %p1415_p10 = pnand %p976_p7, %p188_p8  ;;  %s1324_s13 = smov [#allocation2]  }
   0xf   : > { %s201_s14 = sshll.u32 %s1324_s13, 4  ;;  %s216_s17 = sshll.u32 %s1635_s4, 4  ;;  %s202_s14 = int_to_ptr.vmem [resolvable:$true] %s201_s14  ;;  %s217_s17 = int_to_ptr.hbm [resolvable:$true] %s216_s17 }
  0x10   : > { %p1100_p11 = pneg %p1415_p10  ;;  %s1325_s18 = smov 64  }
  0x11   : > { %s1326_s19 = smov 4   ;;  %s1327_s20 = smov [#allocation5]  }
  0x12   : > { %p1101_p12 = pnand %p1111_p9, %p1100_p11  ;;  %s218_s26 = sshll.u32 %s1327_s20, 4  ;;  %s219_s26 = int_to_ptr.vmem [resolvable:$true] %s218_s26 }
  0x13   : > { %255 = sbr.rel (%p1415_p10) target bundleno = 524 (0x20c), region = 44 }
  0x14   : > { %1103 = dma.hbm_to_vmem [thread:$0]  (!%p1101_p12), %s200_s12, 1024, %s202_s14, [#allocation3], %s1325_s18, %s1325_s18, %s1326_s19  }
  0x15   : > { %1106 = dma.hbm_to_vmem [thread:$0]  (!%p1101_p12), %s217_s17, 1024, %s219_s26, [#allocation6], %s1325_s18, %s1325_s18, %s1326_s19  }
  0x18   : > { %1297 = dma.done.wait (%p1111_p9), [#allocation3], 1024  }
  0x19   : > { %1299 = vsyncadd (%p1111_p9), [#allocation3], 4294966272 }
  0x1a   : > { %1301 = dma.done.wait (%p1111_p9), [#allocation6], 1024  }
  0x1b   : > { %1303 = vsyncadd (%p1111_p9), [#allocation6], 4294966272  ;;  %s984_s28 = sshll.u32 %s1387_s25, 4  ;;  %v1328_v0 = vmov 0   ;;  %v1064_v7 = vld [vmem:[#allocation2 + $0x38] sm:$0xff]  ;;  %v1063_v18 = vld [vmem:[#allocation2 + $0x30] sm:$0xff] }
  0x1c   : > { %1156 = vset.pattern.permute.xlu1 %v1328_v0  ;;  %1155 = vset.pattern.permute.xlu0 %v1328_v0  ;;  %p297_p13 = scmp.lt.s32.totalorder %s984_s28, 63  ;;  %v1062_v19 = vld [vmem:[#allocation2 + $0x28] sm:$0xff]  ;;  %v1061_v20 = vld [vmem:[#allocation2 + $0x20] sm:$0xff]  ;;  %v1060_v21 = vld [vmem:[#allocation2 + $0x18] sm:$0xff]  ;;  %s293_s19 = sand.u32 1, %s1314_s22  }
  0x1d   : > { %1157 = vset.pattern.permute.xlu2 %v1328_v0  ;;  %513 = vmatpush.bf16.msra.mxu0 %v1064_v7  ;;  %v1059_v22 = vld [vmem:[#allocation2 + $0x10] sm:$0xff]  ;;  %v1058_v23 = vld [vmem:[#allocation2 + $0x8] sm:$0xff]  ;;  %v1057_v24 = vld [vmem:[#allocation2] sm:$0xff]  ;;  %s983_s20 = sshll.u32 %s293_s19, 7  ;;  %s864_s13 = scalar_lea.sflag [#allocation4], %s293_s19 }
  0x1e   : > { %s1646_s28 = smov (!%p297_p13, %s984_s28), 63  ;;  %1074 = vmatpush.bf16.msra.mxu2 %v1064_v7  ;;  %v1072_v53 = vld [vmem:[#allocation5 + $0x38] sm:$0xff]  ;;  %v1071_v55 = vld [vmem:[#allocation5 + $0x30] sm:$0xff]  ;;  %v1070_v57 = vld [vmem:[#allocation5 + $0x28] sm:$0xff]  ;;  %s1519_s26 = scalar_lea.vmem [#allocation7], %s983_s20 }
  0x1f   : > { %s985_s29 = sshll.u32 %s1646_s28, 3  ;;  %654 = vmatpush.bf16.msra.mxu1 %v1072_v53  ;;  %1082 = vmatpush.bf16.msra.mxu3 %v1072_v53  ;;  %s1073_s28 = sshll.u32 %s1387_s25, 7 }
  0x20   : > { %s1448_s11 = scalar_lea.vmem %s1631_s0, %s985_s29  ;;  %s1471_s14 = scalar_lea.vmem %s1632_s1, %s985_s29 }
  0x21   : > { %v333_v1 = vld [vmem:[%s1448_s11 + $0x40] sm:$0xff]  ;;  %v335_v3 = vld [vmem:[%s1448_s11 + $0x50] sm:$0xff]  ;;  %v334_v4 = vld [vmem:[%s1448_s11 + $0x48] sm:$0xff]  ;;  %514 = vmatpush.bf16.msra.mxu0 %v1063_v18  ;;  %s875_s10 = scalar_lea.hbm %s1637_s6, %s1073_s28  ;;  %s1272_s17 = scalar_lea.hbm %s1637_s6, 512 }
  0x22   : > { %v325_v2 = vld [vmem:[%s1448_s11] sm:$0xff]  ;;  %383 = vperm.xlu0 %1155, %v333_v1   ;;  %393 = vperm.xlu2 %1157, %v335_v3   ;;  %v326_v5 = vld [vmem:[%s1448_s11 + $0x8] sm:$0xff]  ;;  %v336_v6 = vld [vmem:[%s1448_s11 + $0x58] sm:$0xff]  ;;  %s878_s12 = sshll.u32 %s875_s10, 4  ;;  %s879_s12 = int_to_ptr.hbm [resolvable:$true] %s878_s12 }
  0x23   : > { %343 = vperm.xlu1 %1156, %v325_v2   ;;  %v327_v8 = vld [vmem:[%s1448_s11 + $0x10] sm:$0xff]  ;;  %v328_v9 = vld [vmem:[%s1448_s11 + $0x18] sm:$0xff]  ;;  %v337_v10 = vld [vmem:[%s1448_s11 + $0x60] sm:$0xff]  ;;  %1075 = vmatpush.bf16.msra.mxu2 %v1063_v18 }
  0x24   : > { %v338_v11 = vld [vmem:[%s1448_s11 + $0x68] sm:$0xff]  ;;  %v329_v12 = vld [vmem:[%s1448_s11 + $0x20] sm:$0xff]  ;;  %v339_v14 = vld [vmem:[%s1448_s11 + $0x70] sm:$0xff]  ;;  %655 = vmatpush.bf16.msra.mxu1 %v1071_v55  ;;  %1083 = vmatpush.bf16.msra.mxu3 %v1071_v55 }
  0x25   : > { %v330_v13 = vld [vmem:[%s1448_s11 + $0x28] sm:$0xff]  ;;  %v340_v15 = vld [vmem:[%s1448_s11 + $0x78] sm:$0xff]  ;;  %v331_v16 = vld [vmem:[%s1448_s11 + $0x30] sm:$0xff]  ;;  %515 = vmatpush.bf16.msra.mxu0 %v1062_v19 }
  0x26   : > { %v332_v17 = vld [vmem:[%s1448_s11 + $0x38] sm:$0xff]  ;;  %v309_v27 = vld [vmem:[%s1471_s14] sm:$0xff]  ;;  %v318_v29 = vld [vmem:[%s1471_s14 + $0x48] sm:$0xff]  ;;  %s876_s11 = sshll.u32 %s1519_s26, 4  ;;  %s877_s11 = int_to_ptr.vmem [resolvable:$true] %s876_s11 }
  0x27   : > { %1076 = vmatpush.bf16.msra.mxu2 %v1062_v19  ;;  %v317_v28 = vld [vmem:[%s1471_s14 + $0x40] sm:$0xff]  ;;  %v310_v30 = vld [vmem:[%s1471_s14 + $0x8] sm:$0xff]  ;;  %v319_v40 = vld [vmem:[%s1471_s14 + $0x50] sm:$0xff] }
  0x28   : > { %v320_v42 = vld [vmem:[%s1471_s14 + $0x58] sm:$0xff]  ;;  %v311_v44 = vld [vmem:[%s1471_s14 + $0x10] sm:$0xff]  ;;  %v322_v58 = vld [vmem:[%s1471_s14 + $0x68] sm:$0xff]  ;;  %656 = vmatpush.bf16.msra.mxu1 %v1070_v57  ;;  %1084 = vmatpush.bf16.msra.mxu3 %v1070_v57 }
  0x29   : > { %516 = vmatpush.bf16.msra.mxu0 %v1061_v20  ;;  %v312_v46 = vld [vmem:[%s1471_s14 + $0x18] sm:$0xff]  ;;  %v313_v60 = vld [vmem:[%s1471_s14 + $0x20] sm:$0xff]  ;;  %v314_v62 = vld [vmem:[%s1471_s14 + $0x28] sm:$0xff] }
  0x2a   : > { %388 = vperm.xlu0 %1155, %v334_v4   ;;  %398 = vperm.xlu2 %1157, %v336_v6   ;;  %v321_v61 = vld [vmem:[%s1471_s14 + $0x60] sm:$0xff] }
  0x2b   : > { %348 = vperm.xlu1 %1156, %v326_v5   ;;  %1077 = vmatpush.bf16.msra.mxu2 %v1061_v20  ;;  %v1069_v1 = vld [vmem:[#allocation5 + $0x20] sm:$0xff] }
  0x2c   : > { %657 = vmatpush.bf16.msra.mxu1 %v1069_v1  ;;  %1085 = vmatpush.bf16.msra.mxu3 %v1069_v1 }
  0x2d   : > { %517 = vmatpush.bf16.msra.mxu0 %v1060_v21 }
  0x2f   : > { %1078 = vmatpush.bf16.msra.mxu2 %v1060_v21  ;;  %v1068_v21 = vld [vmem:[#allocation5 + $0x18] sm:$0xff] }
  0x30   : > { %658 = vmatpush.bf16.msra.mxu1 %v1068_v21  ;;  %1086 = vmatpush.bf16.msra.mxu3 %v1068_v21 }
  0x31   : > { %518 = vmatpush.bf16.msra.mxu0 %v1059_v22 }
  0x32   : > { %353 = vperm.xlu0 %1155, %v327_v8   ;;  %403 = vperm.xlu2 %1157, %v337_v10   ;;  %v323_v8 = vld [vmem:[%s1471_s14 + $0x70] sm:$0xff]  ;;  %v324_v10 = vld [vmem:[%s1471_s14 + $0x78] sm:$0xff] }
  0x33   : > { %358 = vperm.xlu1 %1156, %v328_v9   ;;  %1079 = vmatpush.bf16.msra.mxu2 %v1059_v22  ;;  %v1067_v22 = vld [vmem:[#allocation5 + $0x10] sm:$0xff] }
  0x34   : > { %659 = vmatpush.bf16.msra.mxu1 %v1067_v22  ;;  %1087 = vmatpush.bf16.msra.mxu3 %v1067_v22 }
  0x35   : > { %519 = vmatpush.bf16.msra.mxu0 %v1058_v23 }
  0x37   : > { %1080 = vmatpush.bf16.msra.mxu2 %v1058_v23  ;;  %v1066_v23 = vld [vmem:[#allocation5 + $0x8] sm:$0xff] }
  0x38   : > { %660 = vmatpush.bf16.msra.mxu1 %v1066_v23  ;;  %1088 = vmatpush.bf16.msra.mxu3 %v1066_v23 }
  0x39   : > { %520 = vmatpush.bf16.msra.mxu0 %v1057_v24 }
  0x3a   : > { %408 = vperm.xlu0 %1155, %v338_v11   ;;  %368 = vperm.xlu2 %1157, %v330_v13  }
  0x3b   : > { %363 = vperm.xlu1 %1156, %v329_v12   ;;  %1081 = vmatpush.bf16.msra.mxu2 %v1057_v24  ;;  %v316_v12 = vld [vmem:[%s1471_s14 + $0x38] sm:$0xff]  ;;  %v1065_v24 = vld [vmem:[#allocation5] sm:$0xff] }
  0x3c   : > { %661 = vmatpush.bf16.msra.mxu1 %v1065_v24  ;;  %1089 = vmatpush.bf16.msra.mxu3 %v1065_v24 }
  0x42   : > { %413 = vperm.xlu0 %1155, %v339_v14   ;;  %373 = vperm.xlu2 %1157, %v331_v16   ;;  %v315_v14 = vld [vmem:[%s1471_s14 + $0x30] sm:$0xff]  ;;  %s1266_s14 = sshra.s32 %s879_s12, 4  ;;  %s1267_s14 = int_to_ptr.hbm [resolvable:$true] %s1266_s14 }
  0x43   : > { %418 = vperm.xlu1 %1156, %v340_v15   ;;  %s1268_s25 = scalar_lea.hbm %s1267_s14, 128  ;;  %p1273_p3 = scmp.lt.s32.totalorder %s1267_s14, %s1637_s6 }
  0x44   : > { %p1269_p0 = scmp.ne.s32.totalorder %s1267_s14, %s1268_s25  ;;  %p1274_p4 = scmp.lt.s32.totalorder %s1272_s17, %s1268_s25 }
  0x46   : > { %p1270_p1 = pnand %p1269_p0, %p1404_p5  ;;  %p1275_p7 = por %p1274_p4, %p1273_p3 }
  0x48   : > { %p1271_p2 = pneg %p1270_p1 }
  0x4a   : > { %378 = vperm.xlu0 %1155, %v332_v17   ;;  %p1276_p8 = pnand %p1275_p7, %p1271_p2 }
  0x7c   : > { %v394_v34 = vpop.permute.xlu2 %393 }
  0x7d   : > { %v431_v47 = vmul.f32 %v394_v34, %v319_v40 }
  0x84   : > { %v399_v41 = vpop.permute.xlu2 %398 }
  0x85   : > { %v432_v48 = vmul.f32 %v399_v41, %v320_v42 }
  0x87   : > { %v442_v52 = vpack.c.bf16 %v432_v48, %v431_v47 }
  0x8c   : > { %v404_v54 = vpop.permute.xlu2 %403 }
  0x8d   : > { %v433_v3 = vmul.f32 %v404_v54, %v321_v61 }
  0x94   : > { %v384_v25 = vpop.permute.xlu0 %383  ;;  %v369_v2 = vpop.permute.xlu2 %368 }
  0x95   : > { %v344_v26 = vpop.permute.xlu1 %343  ;;  %v429_v35 = vmul.f32 %v384_v25, %v317_v28  ;;  %v426_v4 = vmul.f32 %v369_v2, %v314_v62 }
  0x96   : > { %v421_v31 = vmul.f32 %v344_v26, %v309_v27  ;;  %v1158_v26 = vld [vmem:[%s1634_s3] ss:$0 sm:$0xff] }
  0x9c   : > { %v389_v32 = vpop.permute.xlu0 %388  ;;  %v374_v13 = vpop.permute.xlu2 %373 }
  0x9d   : > { %v349_v33 = vpop.permute.xlu1 %348  ;;  %v430_v36 = vmul.f32 %v389_v32, %v318_v29  ;;  %v427_v18 = vmul.f32 %v374_v13, %v315_v14 }
  0x9e   : > { %v422_v37 = vmul.f32 %v349_v33, %v310_v30 }
  0x9f   : > { %v441_v39 = vpack.c.bf16 %v430_v36, %v429_v35 }
  0xa0   : > { %v437_v38 = vpack.c.bf16 %v422_v37, %v421_v31 }
  0xa1   : > { %541 = vmatmul.bf16.vlgmr.msra.gmra.mxu2 %v441_v39 }
  0xa2   : > { %521 = vmatmul.bf16.vlgmr.msra.gmra.mxu0 %v437_v38 }
  0xa4   : > { %v354_v43 = vpop.permute.xlu0 %353 }
  0xa5   : > { %v359_v45 = vpop.permute.xlu1 %358  ;;  %v423_v49 = vmul.f32 %v354_v43, %v311_v44 }
  0xa6   : > { %v424_v50 = vmul.f32 %v359_v45, %v312_v46 }
  0xa8   : > { %v438_v51 = vpack.c.bf16 %v424_v50, %v423_v49 }
  0xac   : > { %v409_v56 = vpop.permute.xlu0 %408 }
  0xad   : > { %v364_v59 = vpop.permute.xlu1 %363  ;;  %v434_v63 = vmul.f32 %v409_v56, %v322_v58 }
  0xae   : > { %v425_v0 = vmul.f32 %v364_v59, %v313_v60 }
  0xaf   : > { %v443_v7 = vpack.c.bf16 %v434_v63, %v433_v3 }
  0xb0   : > { %v439_v6 = vpack.c.bf16 %v426_v4, %v425_v0 }
  0xb1   : > { %546 = vmatmul.bf16.gmra.mxu2 %v442_v52 }
  0xb2   : > { %526 = vmatmul.bf16.gmra.mxu0 %v438_v51 }
  0xb4   : > { %v414_v5 = vpop.permute.xlu0 %413 }
  0xb5   : > { %v419_v9 = vpop.permute.xlu1 %418  ;;  %v435_v15 = vmul.f32 %v414_v5, %v323_v8 }
  0xb6   : > { %v436_v16 = vmul.f32 %v419_v9, %v324_v10 }
  0xb8   : > { %v444_v20 = vpack.c.bf16 %v436_v16, %v435_v15 }
  0xbc   : > { %v379_v11 = vpop.permute.xlu0 %378 }
  0xbd   : > { %v428_v17 = vmul.f32 %v379_v11, %v316_v12 }
  0xbf   : > { %v440_v19 = vpack.c.bf16 %v428_v17, %v427_v18  ;;  %v1495_v18 = vld [vmem:[%s1636_s5] ss:$0 sm:$0xff] }
  0xc1   : > { %551 = vmatmul.bf16.gmra.mxu2 %v443_v7 }
  0xc2   : > { %531 = vmatmul.bf16.gmra.mxu0 %v439_v6 }
  0xd1   : > { %556 = vmatmul.bf16.gmra.mxu2 %v444_v20 }
  0xd2   : > { %536 = vmatmul.bf16.gmra.mxu0 %v440_v19 }
 0x11f   : > { %v522_v25 = vpop.f32.mrf.mxu0 }
 0x120   : > { %v523_v28 = vadd.f32 %v1158_v26, %v522_v25 }
 0x122   : > { %v562_v31 = vmax.f32 %v523_v28, 0.0 }
 0x124   : > { %v542_v27 = vpop.f32.mrf.mxu2 }
 0x125   : > { %v543_v33 = vadd.f32 %v1158_v26, %v542_v27 }
 0x127   : > { %v524_v29 = vpop.f32.mrf.mxu0  ;;  %v570_v38 = vmax.f32 %v543_v33, 0.0 }
 0x128   : > { %v525_v30 = vadd.f32 %v1158_v26, %v524_v29 }
 0x12a   : > { %v563_v32 = vmax.f32 %v525_v30, 0.0 }
 0x12c   : > { %v578_v34 = vpack.c.bf16 %v563_v32, %v562_v31  ;;  %v544_v35 = vpop.f32.mrf.mxu2 }
 0x12d   : > { %v545_v36 = vadd.f32 %v1158_v26, %v544_v35 }
 0x12e   : > { %662 = vmatmul.bf16.vlgmr.msra.gmra.mxu1 %v578_v34 }
 0x12f   : > { %v527_v37 = vpop.f32.mrf.mxu0  ;;  %v571_v39 = vmax.f32 %v545_v36, 0.0 }
 0x130   : > { %v528_v42 = vadd.f32 %v1158_v26, %v527_v37 }
 0x131   : > { %v582_v40 = vpack.c.bf16 %v571_v39, %v570_v38 }
 0x132   : > { %v564_v45 = vmax.f32 %v528_v42, 0.0 }
 0x133   : > { %682 = vmatmul.bf16.vlgmr.msra.gmra.mxu3 %v582_v40 }
 0x134   : > { %v547_v41 = vpop.f32.mrf.mxu2 }
 0x135   : > { %v548_v47 = vadd.f32 %v1158_v26, %v547_v41 }
 0x137   : > { %v529_v43 = vpop.f32.mrf.mxu0  ;;  %v572_v52 = vmax.f32 %v548_v47, 0.0 }
 0x138   : > { %v530_v44 = vadd.f32 %v1158_v26, %v529_v43 }
 0x13a   : > { %v565_v46 = vmax.f32 %v530_v44, 0.0 }
 0x13c   : > { %v579_v48 = vpack.c.bf16 %v565_v46, %v564_v45  ;;  %v549_v49 = vpop.f32.mrf.mxu2 }
 0x13d   : > { %v550_v50 = vadd.f32 %v1158_v26, %v549_v49 }
 0x13e   : > { %667 = vmatmul.bf16.gmra.mxu1 %v579_v48 }
 0x13f   : > { %v532_v51 = vpop.f32.mrf.mxu0  ;;  %v573_v53 = vmax.f32 %v550_v50, 0.0 }
 0x140   : > { %v533_v56 = vadd.f32 %v1158_v26, %v532_v51 }
 0x141   : > { %v583_v54 = vpack.c.bf16 %v573_v53, %v572_v52 }
 0x142   : > { %v566_v59 = vmax.f32 %v533_v56, 0.0 }
 0x143   : > { %687 = vmatmul.bf16.gmra.mxu3 %v583_v54 }
 0x144   : > { %v552_v55 = vpop.f32.mrf.mxu2 }
 0x145   : > { %v553_v61 = vadd.f32 %v1158_v26, %v552_v55 }
 0x147   : > { %v534_v57 = vpop.f32.mrf.mxu0  ;;  %v574_v2 = vmax.f32 %v553_v61, 0.0 }
 0x148   : > { %v535_v58 = vadd.f32 %v1158_v26, %v534_v57 }
 0x14a   : > { %v567_v60 = vmax.f32 %v535_v58, 0.0 }
 0x14c   : > { %v580_v62 = vpack.c.bf16 %v567_v60, %v566_v59  ;;  %v554_v63 = vpop.f32.mrf.mxu2 }
 0x14d   : > { %v555_v0 = vadd.f32 %v1158_v26, %v554_v63 }
 0x14e   : > { %672 = vmatmul.bf16.gmra.mxu1 %v580_v62 }
 0x14f   : > { %v537_v1 = vpop.f32.mrf.mxu0  ;;  %v575_v3 = vmax.f32 %v555_v0, 0.0 }
 0x150   : > { %v538_v6 = vadd.f32 %v1158_v26, %v537_v1 }
 0x151   : > { %v584_v4 = vpack.c.bf16 %v575_v3, %v574_v2 }
 0x152   : > { %v568_v9 = vmax.f32 %v538_v6, 0.0 }
 0x153   : > { %692 = vmatmul.bf16.gmra.mxu3 %v584_v4 }
 0x154   : > { %v557_v5 = vpop.f32.mrf.mxu2 }
 0x155   : > { %v558_v11 = vadd.f32 %v1158_v26, %v557_v5 }
 0x157   : > { %v539_v7 = vpop.f32.mrf.mxu0  ;;  %v576_v15 = vmax.f32 %v558_v11, 0.0 }
 0x158   : > { %v540_v8 = vadd.f32 %v1158_v26, %v539_v7 }
 0x15a   : > { %v569_v10 = vmax.f32 %v540_v8, 0.0 }
 0x15c   : > { %v581_v12 = vpack.c.bf16 %v569_v10, %v568_v9  ;;  %v559_v13 = vpop.f32.mrf.mxu2 }
 0x15d   : > { %v560_v14 = vadd.f32 %v1158_v26, %v559_v13 }
 0x15e   : > { %677 = vmatmul.bf16.gmra.mxu1 %v581_v12 }
 0x15f   : > { %v577_v16 = vmax.f32 %v560_v14, 0.0 }
 0x161   : > { %v585_v17 = vpack.c.bf16 %v577_v16, %v576_v15 }
 0x163   : > { %697 = vmatmul.bf16.gmra.mxu3 %v585_v17 }
 0x1ab   : > { %v663_v19 = vpop.f32.mrf.mxu1 }
 0x1ac   : > { %v664_v20 = vadd.f32 %v1495_v18, %v663_v19 }
 0x1ae   : > { %v703_v21 = vmul.f32 %v664_v20, %v664_v20 }
 0x1b0   : > { %v719_v22 = vmul.f32 %v703_v21, %v664_v20 }
 0x1b2   : > { %v735_v23 = vmul.f32 0.044715, %v719_v22 }
 0x1b3   : > { %v665_v24 = vpop.f32.mrf.mxu1 }
 0x1b4   : > { %v751_v25 = vadd.f32 %v735_v23, %v664_v20  ;;  %v666_v26 = vadd.f32 %v1495_v18, %v665_v24 }
 0x1b6   : > { %v767_v27 = vmul.f32 0.7978846, %v751_v25  ;;  %v704_v28 = vmul.f32 %v666_v26, %v666_v26  ;;  %v683_v29 = vpop.f32.mrf.mxu3 }
 0x1b7   : > { %v684_v31 = vadd.f32 %v1495_v18, %v683_v29 }
 0x1b8   : > { %1160 = vtanh.f32 %v767_v27  ;;  %v720_v30 = vmul.f32 %v704_v28, %v666_v26 }
 0x1b9   : > { %v711_v33 = vmul.f32 %v684_v31, %v684_v31 }
 0x1ba   : > { %v736_v32 = vmul.f32 0.044715, %v720_v30 }
 0x1bb   : > { %v668_v34 = vpop.f32.mrf.mxu1  ;;  %v727_v36 = vmul.f32 %v711_v33, %v684_v31 }
 0x1bc   : > { %v752_v35 = vadd.f32 %v736_v32, %v666_v26  ;;  %v1502_v37 = vadd.f32 %v1495_v18, %v668_v34 }
 0x1bd   : > { %v743_v40 = vmul.f32 0.044715, %v727_v36 }
 0x1be   : > { %v1161_v38 = vpop.eup %1160  ;;  %v768_v39 = vmul.f32 0.7978846, %v752_v35  ;;  %v705_v41 = vmul.f32 %v1502_v37, %v1502_v37  ;;  %v685_v43 = vpop.f32.mrf.mxu3 }
 0x1bf   : > { %v799_v42 = vadd.f32 1.0, %v1161_v38  ;;  %v759_v44 = vadd.f32 %v743_v40, %v684_v31  ;;  %v1510_v46 = vadd.f32 %v1495_v18, %v685_v43 }
 0x1c0   : > { %1162 = vtanh.f32 %v768_v39  ;;  %v721_v45 = vmul.f32 %v705_v41, %v1502_v37 }
 0x1c1   : > { %v815_v47 = vmul.f32 0.5, %v799_v42  ;;  %v775_v48 = vmul.f32 0.7978846, %v759_v44  ;;  %v712_v50 = vmul.f32 %v1510_v46, %v1510_v46 }
 0x1c2   : > { %v737_v49 = vmul.f32 0.044715, %v721_v45 }
 0x1c3   : > { %v831_v51 = vmul.f32 %v815_v47, %v664_v20  ;;  %v670_v52 = vpop.f32.mrf.mxu1  ;;  %1164 = vtanh.f32 %v775_v48  ;;  %v728_v54 = vmul.f32 %v712_v50, %v1510_v46 }
 0x1c4   : > { %v753_v53 = vadd.f32 %v737_v49, %v1502_v37  ;;  %v1517_v55 = vadd.f32 %v1495_v18, %v670_v52 }
 0x1c5   : > { %847 = vst [vmem:[%s1519_s26] sm:$0xff] %v831_v51  ;;  %v744_v58 = vmul.f32 0.044715, %v728_v54 }
 0x1c6   : > { %v1163_v56 = vpop.eup %1162  ;;  %v769_v57 = vmul.f32 0.7978846, %v753_v53  ;;  %v706_v59 = vmul.f32 %v1517_v55, %v1517_v55  ;;  %v688_v61 = vpop.f32.mrf.mxu3 }
 0x1c7   : > { %v800_v60 = vadd.f32 1.0, %v1163_v56  ;;  %v760_v62 = vadd.f32 %v744_v58, %v1510_v46  ;;  %v1527_v0 = vadd.f32 %v1495_v18, %v688_v61 }
 0x1c8   : > { %1166 = vtanh.f32 %v769_v57  ;;  %v722_v63 = vmul.f32 %v706_v59, %v1517_v55 }
 0x1c9   : > { %v816_v1 = vmul.f32 0.5, %v800_v60  ;;  %v1165_v2 = vpop.eup %1164  ;;  %v776_v3 = vmul.f32 0.7978846, %v760_v62  ;;  %v713_v5 = vmul.f32 %v1527_v0, %v1527_v0 }
 0x1ca   : > { %v738_v4 = vmul.f32 0.044715, %v722_v63  ;;  %v807_v7 = vadd.f32 1.0, %v1165_v2 }
 0x1cb   : > { %v832_v6 = vmul.f32 %v816_v1, %v666_v26  ;;  %v673_v8 = vpop.f32.mrf.mxu1  ;;  %1168 = vtanh.f32 %v776_v3  ;;  %v729_v10 = vmul.f32 %v713_v5, %v1527_v0 }
 0x1cc   : > { %v754_v9 = vadd.f32 %v738_v4, %v1517_v55  ;;  %v1534_v11 = vadd.f32 %v1495_v18, %v673_v8  ;;  %v823_v12 = vmul.f32 0.5, %v807_v7 }
 0x1cd   : > { %848 = vst [vmem:[%s1519_s26 + $0x8] sm:$0xff] %v832_v6  ;;  %v745_v15 = vmul.f32 0.044715, %v729_v10 }
 0x1ce   : > { %v1167_v13 = vpop.eup %1166  ;;  %v770_v14 = vmul.f32 0.7978846, %v754_v9  ;;  %v707_v16 = vmul.f32 %v1534_v11, %v1534_v11  ;;  %v839_v17 = vmul.f32 %v823_v12, %v684_v31  ;;  %v690_v20 = vpop.f32.mrf.mxu3 }
 0x1cf   : > { %v801_v19 = vadd.f32 1.0, %v1167_v13  ;;  %v761_v21 = vadd.f32 %v745_v15, %v1527_v0  ;;  %v1542_v23 = vadd.f32 %v1495_v18, %v690_v20 }
 0x1d0   : > { %1170 = vtanh.f32 %v770_v14  ;;  %v723_v22 = vmul.f32 %v707_v16, %v1534_v11  ;;  %855 = vst [vmem:[%s1519_s26 + $0x40] sm:$0xff] %v839_v17 }
 0x1d1   : > { %v817_v24 = vmul.f32 0.5, %v801_v19  ;;  %v1169_v25 = vpop.eup %1168  ;;  %v777_v26 = vmul.f32 0.7978846, %v761_v21  ;;  %v714_v28 = vmul.f32 %v1542_v23, %v1542_v23 }
 0x1d2   : > { %v739_v27 = vmul.f32 0.044715, %v723_v22  ;;  %v808_v30 = vadd.f32 1.0, %v1169_v25 }
 0x1d3   : > { %v833_v29 = vmul.f32 %v817_v24, %v1502_v37  ;;  %v675_v31 = vpop.f32.mrf.mxu1  ;;  %1172 = vtanh.f32 %v777_v26  ;;  %v730_v33 = vmul.f32 %v714_v28, %v1542_v23 }
 0x1d4   : > { %v755_v32 = vadd.f32 %v739_v27, %v1534_v11  ;;  %v1551_v34 = vadd.f32 %v1495_v18, %v675_v31  ;;  %v824_v35 = vmul.f32 0.5, %v808_v30 }
 0x1d5   : > { %849 = vst [vmem:[%s1519_s26 + $0x10] sm:$0xff] %v833_v29  ;;  %v746_v39 = vmul.f32 0.044715, %v730_v33 }
 0x1d6   : > { %v1171_v36 = vpop.eup %1170  ;;  %v771_v38 = vmul.f32 0.7978846, %v755_v32  ;;  %v708_v40 = vmul.f32 %v1551_v34, %v1551_v34  ;;  %v840_v37 = vmul.f32 %v824_v35, %v1510_v46  ;;  %v693_v42 = vpop.f32.mrf.mxu3 }
 0x1d7   : > { %v802_v41 = vadd.f32 1.0, %v1171_v36  ;;  %v762_v43 = vadd.f32 %v746_v39, %v1542_v23  ;;  %v1560_v45 = vadd.f32 %v1495_v18, %v693_v42 }
 0x1d8   : > { %1174 = vtanh.f32 %v771_v38  ;;  %v724_v44 = vmul.f32 %v708_v40, %v1551_v34  ;;  %856 = vst [vmem:[%s1519_s26 + $0x48] sm:$0xff] %v840_v37 }
 0x1d9   : > { %v818_v47 = vmul.f32 0.5, %v802_v41  ;;  %v1173_v48 = vpop.eup %1172  ;;  %v778_v49 = vmul.f32 0.7978846, %v762_v43  ;;  %v715_v51 = vmul.f32 %v1560_v45, %v1560_v45 }
 0x1da   : > { %v740_v50 = vmul.f32 0.044715, %v724_v44  ;;  %v809_v52 = vadd.f32 1.0, %v1173_v48 }
 0x1db   : > { %v834_v46 = vmul.f32 %v818_v47, %v1517_v55  ;;  %v678_v53 = vpop.f32.mrf.mxu1  ;;  %1176 = vtanh.f32 %v778_v49  ;;  %v731_v56 = vmul.f32 %v715_v51, %v1560_v45 }
 0x1dc   : > { %v756_v54 = vadd.f32 %v740_v50, %v1551_v34  ;;  %v1569_v57 = vadd.f32 %v1495_v18, %v678_v53  ;;  %v825_v58 = vmul.f32 0.5, %v809_v52 }
 0x1dd   : > { %850 = vst [vmem:[%s1519_s26 + $0x18] sm:$0xff] %v834_v46  ;;  %v747_v61 = vmul.f32 0.044715, %v731_v56 }
 0x1de   : > { %v1175_v59 = vpop.eup %1174  ;;  %v772_v60 = vmul.f32 0.7978846, %v756_v54  ;;  %v709_v62 = vmul.f32 %v1569_v57, %v1569_v57  ;;  %v841_v55 = vmul.f32 %v825_v58, %v1527_v0  ;;  %v695_v1 = vpop.f32.mrf.mxu3 }
 0x1df   : > { %v803_v63 = vadd.f32 1.0, %v1175_v59  ;;  %v763_v2 = vadd.f32 %v747_v61, %v1560_v45  ;;  %v696_v4 = vadd.f32 %v1495_v18, %v695_v1 }
 0x1e0   : > { %1178 = vtanh.f32 %v772_v60  ;;  %v725_v3 = vmul.f32 %v709_v62, %v1569_v57  ;;  %857 = vst [vmem:[%s1519_s26 + $0x50] sm:$0xff] %v841_v55 }
 0x1e1   : > { %v819_v5 = vmul.f32 0.5, %v803_v63  ;;  %v1177_v6 = vpop.eup %1176  ;;  %v779_v7 = vmul.f32 0.7978846, %v763_v2  ;;  %v716_v9 = vmul.f32 %v696_v4, %v696_v4 }
 0x1e2   : > { %v741_v8 = vmul.f32 0.044715, %v725_v3  ;;  %v810_v12 = vadd.f32 1.0, %v1177_v6 }
 0x1e3   : > { %v835_v10 = vmul.f32 %v819_v5, %v1534_v11  ;;  %v680_v0 = vpop.f32.mrf.mxu1  ;;  %1180 = vtanh.f32 %v779_v7  ;;  %v732_v14 = vmul.f32 %v716_v9, %v696_v4 }
 0x1e4   : > { %v757_v13 = vadd.f32 %v741_v8, %v1569_v57  ;;  %v681_v15 = vadd.f32 %v1495_v18, %v680_v0  ;;  %v826_v16 = vmul.f32 0.5, %v810_v12 }
 0x1e5   : > { %851 = vst [vmem:[%s1519_s26 + $0x20] sm:$0xff] %v835_v10  ;;  %v748_v20 = vmul.f32 0.044715, %v732_v14 }
 0x1e6   : > { %v1179_v17 = vpop.eup %1178  ;;  %v773_v19 = vmul.f32 0.7978846, %v757_v13  ;;  %v710_v21 = vmul.f32 %v681_v15, %v681_v15  ;;  %v842_v22 = vmul.f32 %v826_v16, %v1542_v23  ;;  %v698_v25 = vpop.f32.mrf.mxu3 }
 0x1e7   : > { %v804_v24 = vadd.f32 1.0, %v1179_v17  ;;  %v764_v11 = vadd.f32 %v748_v20, %v696_v4  ;;  %v699_v27 = vadd.f32 %v1495_v18, %v698_v25 }
 0x1e8   : > { %1182 = vtanh.f32 %v773_v19  ;;  %v726_v26 = vmul.f32 %v710_v21, %v681_v15  ;;  %858 = vst [vmem:[%s1519_s26 + $0x58] sm:$0xff] %v842_v22 }
 0x1e9   : > { %v820_v28 = vmul.f32 0.5, %v804_v24  ;;  %v1181_v29 = vpop.eup %1180  ;;  %v780_v30 = vmul.f32 0.7978846, %v764_v11  ;;  %v717_v32 = vmul.f32 %v699_v27, %v699_v27 }
 0x1ea   : > { %v742_v31 = vmul.f32 0.044715, %v726_v26  ;;  %v811_v35 = vadd.f32 1.0, %v1181_v29 }
 0x1eb   : > { %v836_v33 = vmul.f32 %v820_v28, %v1551_v34  ;;  %1184 = vtanh.f32 %v780_v30  ;;  %v733_v36 = vmul.f32 %v717_v32, %v699_v27 }
 0x1ec   : > { %v758_v23 = vadd.f32 %v742_v31, %v681_v15  ;;  %v827_v38 = vmul.f32 0.5, %v811_v35 }
 0x1ed   : > { %852 = vst [vmem:[%s1519_s26 + $0x28] sm:$0xff] %v836_v33  ;;  %v749_v37 = vmul.f32 0.044715, %v733_v36 }
 0x1ee   : > { %v1183_v39 = vpop.eup %1182  ;;  %v774_v40 = vmul.f32 0.7978846, %v758_v23  ;;  %v843_v41 = vmul.f32 %v827_v38, %v1560_v45  ;;  %v700_v43 = vpop.f32.mrf.mxu3 }
 0x1ef   : > { %v805_v42 = vadd.f32 1.0, %v1183_v39  ;;  %v765_v44 = vadd.f32 %v749_v37, %v699_v27  ;;  %v701_v47 = vadd.f32 %v1495_v18, %v700_v43 }
 0x1f0   : > { %1186 = vtanh.f32 %v774_v40  ;;  %859 = vst [vmem:[%s1519_s26 + $0x60] sm:$0xff] %v843_v41 }
 0x1f1   : > { %v821_v34 = vmul.f32 0.5, %v805_v42  ;;  %v1185_v48 = vpop.eup %1184  ;;  %v781_v49 = vmul.f32 0.7978846, %v765_v44  ;;  %v718_v50 = vmul.f32 %v701_v47, %v701_v47 }
 0x1f2   : > { %v812_v46 = vadd.f32 1.0, %v1185_v48 }
 0x1f3   : > { %v837_v51 = vmul.f32 %v821_v34, %v1569_v57  ;;  %1188 = vtanh.f32 %v781_v49  ;;  %v734_v52 = vmul.f32 %v718_v50, %v701_v47 }
 0x1f4   : > { %v828_v45 = vmul.f32 0.5, %v812_v46 }
 0x1f5   : > { %853 = vst [vmem:[%s1519_s26 + $0x30] sm:$0xff] %v837_v51  ;;  %v750_v54 = vmul.f32 0.044715, %v734_v52 }
 0x1f6   : > { %v1187_v53 = vpop.eup %1186  ;;  %v844_v56 = vmul.f32 %v828_v45, %v696_v4 }
 0x1f7   : > { %v806_v18 = vadd.f32 1.0, %v1187_v53  ;;  %v766_v58 = vadd.f32 %v750_v54, %v701_v47 }
 0x1f8   : > { %860 = vst [vmem:[%s1519_s26 + $0x68] sm:$0xff] %v844_v56 }
 0x1f9   : > { %v822_v59 = vmul.f32 0.5, %v806_v18  ;;  %v1189_v60 = vpop.eup %1188  ;;  %v782_v61 = vmul.f32 0.7978846, %v766_v58 }
 0x1fa   : > { %v813_v57 = vadd.f32 1.0, %v1189_v60 }
 0x1fb   : > { %v838_v62 = vmul.f32 %v822_v59, %v681_v15  ;;  %1190 = vtanh.f32 %v782_v61 }
 0x1fc   : > { %v829_v55 = vmul.f32 0.5, %v813_v57 }
 0x1fd   : > { %854 = vst [vmem:[%s1519_s26 + $0x38] sm:$0xff] %v838_v62 }
 0x1fe   : > { %v845_v63 = vmul.f32 %v829_v55, %v699_v27 }
 0x200   : > { %861 = vst [vmem:[%s1519_s26 + $0x70] sm:$0xff] %v845_v63 }
 0x201   : > { %v1191_v1 = vpop.eup %1190 }
 0x202   : > { %v814_v2 = vadd.f32 1.0, %v1191_v1 }
 0x204   : > { %v830_v3 = vmul.f32 0.5, %v814_v2 }
 0x206   : > { %v846_v4 = vmul.f32 %v830_v3, %v701_v47 }
 0x208   : > { %862 = vst [vmem:[%s1519_s26 + $0x78] sm:$0xff] %v846_v4 }
 0x209   : > { %1279 = shalt.err (!%p1276_p8)
}
 0x20a   : > { %s1329_s19 = smov 128   ;;  %s1330_s26 = smov 8  }
 0x20b   : > { %1098 = dma.vmem_to_hbm [thread:$0]  (%p1404_p5), %s877_s11, 2048, %s879_s12, %s864_s13, %s1329_s19, %s1329_s19, %s1330_s26  }
 0x20c PF: > { %p1115_p9 = scmp.ge.s32.totalorder %s1322_s24, 2  ;;  %s893_s28 = sand.u32 1, %s1310_s21  }
 0x20d   : > { %s894_s29 = scalar_lea.sflag [#allocation4], %s893_s28 }
 0x20e   : > { %p1108_p10 = pnand %p1115_p9, %p1408_p6 }
 0x210   : > { %p1109_p11 = pneg %p1108_p10 }
 0x212   : > { %1305 = dma.done.wait (%p1109_p11), %s894_s29, 2048  }
 0x213   : > { %1307 = vsyncadd (%p1109_p11), %s894_s29, 4294965248  ;;  %p18_p12 = scmp.ge.s32.totalorder %s1391_s27, 6   ;;  %s1641_s21 = smov %s1314_s22 }
 0x214   : > { %s1642_s22 = smov %s1318_s23  ;;  %s1643_s23 = smov %s1402_s30 }
 0x215   : > { %s1644_s24 = smov %s1391_s27  ;;  %20 = sbr.rel (!%p18_p12) target bundleno = 5 (0x5), region = 91 }
 0x21a   :  { %900 = vsyncpa [#allocation3], 1 }
 0x21b   :  { %902 = vsyncpa [#allocation3 + $0x1], 1 }
 0x21c   :  { %903 = vsyncpa [#allocation6], 1 }
 0x21d   :  { %904 = vsyncpa [#allocation4], 1 }
 0x21e   :  { %906 = vsyncpa [#allocation4 + $0x1], 1 }

</bundles_post_ra>
